<compile_context>
chip_gen: v7x
topology: tpu7x:2x2x1
jax: 0.10.0
libtpu: 0.0.40
codegen_flags: <defaults>
</compile_context>

<pallas_src>
import functools

import jax
import jax.numpy as jnp
from jax.experimental import pallas as pl
from jax.experimental.pallas import tpu as pltpu


def _channel_attn_kernel(x_ref, w1t_ref, w2t_ref, o_ref, sum_acc, max_acc,
                         *, total_s, ts, needs_mask):
    # x_ref: (tn, C, ts) native dtype ; w1t_ref: (C, C_hid) ; w2t_ref: (C_hid, C)
    s_idx = pl.program_id(1)
    num_s = pl.num_programs(1)

    @pl.when(s_idx == 0)
    def _init():
        sum_acc[...] = jnp.zeros_like(sum_acc)
        max_acc[...] = jnp.full_like(max_acc, -jnp.inf)

    x = x_ref[...]                                    # native dtype (bf16 stays bf16)

    def _accumulate(x_sum_f32, x_max_native):
        sum_acc[...] += jnp.sum(x_sum_f32, axis=-1)                    # (tn, C) f32
        tile_max = jnp.max(x_max_native, axis=-1)                      # native dtype
        max_acc[...] = jnp.maximum(max_acc[...], tile_max.astype(jnp.float32))

    if needs_mask:
        # Hot loop: full tiles, no mask work at all.
        @pl.when(s_idx < num_s - 1)
        def _full():
            _accumulate(x.astype(jnp.float32), x)

        # Tail tile only: mask lanes past the real S extent.
        @pl.when(s_idx == num_s - 1)
        def _tail():
            valid = total_s - s_idx * ts
            lane = jax.lax.broadcasted_iota(jnp.int32, (1, 1, ts), 2)
            in_range = lane < valid
            x_sum = jnp.where(in_range, x.astype(jnp.float32), 0.0)
            x_max = jnp.where(in_range, x, jnp.array(-jnp.inf, dtype=x.dtype))
            _accumulate(x_sum, x_max)
    else:
        _accumulate(x.astype(jnp.float32), x)

    # Finalize once per n-block (tiny matmuls + sigmoid, off the hot path).
    @pl.when(s_idx == num_s - 1)
    def _finalize():
        avg = sum_acc[...] * (1.0 / float(total_s))                    # true mean (tn, C)
        mx = max_acc[...]                                              # (tn, C)
        tn = avg.shape[0]
        v = jnp.concatenate([avg, mx], axis=0)                         # (2*tn, C) fused fc
        h = jnp.maximum(
            jnp.dot(v, w1t_ref[...], preferred_element_type=jnp.float32), 0.0)
        y = jnp.dot(h, w2t_ref[...], preferred_element_type=jnp.float32)
        out = y[:tn] + y[tn:]                                          # fc(avg) + fc(max)
        o_ref[...] = jax.nn.sigmoid(out)[:, None, :].astype(o_ref.dtype)


def _padded_bytes(rows, cols, itemsize=4):
    return ((rows + 7) // 8 * 8) * ((cols + 127) // 128 * 128) * itemsize


def channel_attn(x_ncdhw, w1, w2, *, force_s_tile=None):
    """x_ncdhw: (N, C, D, H, W); w1: (C_hid, C, 1, 1, 1); w2: (C, C_hid, 1, 1, 1)."""
    N, C, D, H, W = x_ncdhw.shape
    S = D * H * W
    c_hid = w1.shape[0]

    # Keep x in its native dtype (bf16 stays bf16 -> half the HBM reads).
    x_flat = x_ncdhw.reshape(N, C, S)
    w1t = jnp.transpose(w1.reshape(c_hid, C)).astype(jnp.float32)      # (C, C_hid)
    w2t = jnp.transpose(w2.reshape(C, c_hid)).astype(jnp.float32)      # (C_hid, C)

    # ---- Batch tile: guarantee >=2 "parallel" n-blocks whenever N >= 2 ----
    # (v7x has 2 TensorCores; a single n-block would leave one idle.)
    if N <= 1:
        tn = 1
    elif N <= 16:
        tn = (N + 1) // 2
    else:
        tn = 8
    num_n = pl.cdiv(N, tn)
    # Note: if N % tn != 0, padded rows of the last n-block read undefined HBM
    # data; rows are fully independent and the writeback is clipped, so valid
    # rows are unaffected.

    # ---- S tile from a VMEM byte budget (dtype-, C-, tn-aware) ----
    dsize = jnp.dtype(x_ncdhw.dtype).itemsize
    try:
        vmem_phys = int(pltpu.get_tpu_info().vmem_capacity_bytes)      # 64 MiB v7x, 128 MiB v5e/v6e
    except Exception:
        vmem_phys = 64 * 1024 * 1024                                   # conservative fallback
    scratch_bytes = 2 * _padded_bytes(tn, C)                           # f32 sum + max accumulators
    weight_bytes = _padded_bytes(C, c_hid) + _padded_bytes(c_hid, C)   # whole-array VMEM constants
    out_bytes = 2 * tn * _padded_bytes(1, C)                           # double-buffered out block
    overhead = scratch_bytes + weight_bytes + out_bytes + (1 << 20)
    vmem_budget = (vmem_phys * 7) // 10                                # leave physical headroom
    x_block_budget = min(16 * 1024 * 1024,
                         max((vmem_budget - overhead) // 2, 512 * 1024))

    row_bytes = tn * C * dsize
    if force_s_tile is not None:
        ts = min(force_s_tile, S)
    elif S * row_bytes <= x_block_budget or S <= 128:
        ts = S                                   # full-S block: fully contiguous per-row DMA
    else:
        ts = max(((x_block_budget // row_bytes) // 128) * 128, 128)
        if ts >= S:
            ts = S
    needs_mask = (S % ts) != 0
    num_s = pl.cdiv(S, ts)

    # vmem_limit from the actual double-buffered block sizes (+ headroom).
    x_pipe_bytes = 2 * tn * C * ts * dsize
    vmem_limit = int(min(max(x_pipe_bytes + overhead + (4 << 20), 16 << 20),
                         (vmem_phys * 9) // 10))

    kernel = functools.partial(
        _channel_attn_kernel, total_s=S, ts=ts, needs_mask=needs_mask)

    out = pl.pallas_call(
        kernel,
        out_shape=jax.ShapeDtypeStruct((N, 1, C), jnp.float32),
        grid_spec=pltpu.PrefetchScalarGridSpec(
            num_scalar_prefetch=0,
            grid=(num_n, num_s),                             # reduction axis (S) last
            in_specs=[
                pl.BlockSpec((tn, C, ts), lambda n, s: (n, 0, s)),
                pl.BlockSpec(memory_space=pltpu.MemorySpace.VMEM),   # w1t (whole array, no pipelining)
                pl.BlockSpec(memory_space=pltpu.MemorySpace.VMEM),   # w2t (whole array, no pipelining)
            ],
            out_specs=pl.BlockSpec((tn, 1, C), lambda n, s: (n, 0, 0)),
            scratch_shapes=[
                pltpu.VMEM((tn, C), jnp.float32),            # running sum
                pltpu.VMEM((tn, C), jnp.float32),            # running max
            ],
        ),
        compiler_params=pltpu.CompilerParams(
            dimension_semantics=("parallel", "arbitrary"),
            vmem_limit_bytes=vmem_limit,
        ),
    )(x_flat, w1t, w2t)

    return out.reshape(N, C, 1, 1, 1)


def channel_attn_ref(x_ncdhw, w1, w2):
    """Pure-JAX reference matching the PyTorch forward."""
    N, C = x_ncdhw.shape[:2]
    c_hid = w1.shape[0]
    xf = x_ncdhw.astype(jnp.float32)
    avg = jnp.mean(xf, axis=(2, 3, 4))               # (N, C)
    mx = jnp.max(xf, axis=(2, 3, 4))                 # (N, C)
    w1m = w1.reshape(c_hid, C).astype(jnp.float32)
    w2m = w2.reshape(C, c_hid).astype(jnp.float32)

    def fc(v):
        h = jnp.maximum(v @ w1m.T, 0.0)
        return h @ w2m.T

    out = jax.nn.sigmoid(fc(avg) + fc(mx))
    return out.reshape(N, C, 1, 1, 1)


if __name__ == "__main__":
    # Shapes consistent with the module: in_planes=32 -> hidden = max(32//16, 1) = 2
    N, C, D, H, W = 2, 32, 4, 4, 4
    c_hid = max(C // 16, 1)

    key = jax.random.PRNGKey(0)
    kx, k1, k2, kx2 = jax.random.split(key, 4)
    x = jax.random.normal(kx, (N, C, D, H, W), dtype=jnp.float32)
    # Conv3d weight shapes: (out_ch, in_ch, 1, 1, 1), no bias.
    w1 = jax.random.normal(k1, (c_hid, C, 1, 1, 1), dtype=jnp.float32) * 0.1
    w2 = jax.random.normal(k2, (C, c_hid, 1, 1, 1), dtype=jnp.float32) * 0.1

    # Test 1: single-step S reduction (ts == S), 2 parallel n-blocks.
    out = jax.block_until_ready(channel_attn(x, w1, w2))
    ref = channel_attn_ref(x, w1, w2)
    assert out.shape == (N, C, 1, 1, 1), out.shape
    assert jnp.allclose(out, ref, atol=1e-5, rtol=1e-5), "mismatch (single tile)"

    # Test 2: multi-step S reduction with a masked partial tail tile
    # (S = 192, forced tile = 128 -> 2 grid steps, 64 valid lanes in the tail).
    x2 = jax.random.normal(kx2, (N, C, 4, 8, 6), dtype=jnp.float32)
    out2 = jax.block_until_ready(channel_attn(x2, w1, w2, force_s_tile=128))
    ref2 = channel_attn_ref(x2, w1, w2)
    assert jnp.allclose(out2, ref2, atol=1e-5, rtol=1e-5), "mismatch (tiled + mask)"

    # Test 3: bf16 input exercises the native-dtype max path + f32 sum accumulation.
    x3 = x2.astype(jnp.bfloat16)
    out3 = jax.block_until_ready(channel_attn(x3, w1, w2, force_s_tile=128))
    ref3 = channel_attn_ref(x3, w1, w2)
    assert jnp.allclose(out3, ref3, atol=2e-3, rtol=2e-3), "mismatch (bf16)"

    print("KERNEL_OK")
</pallas_src>

<mosaic_0001>
module attributes {stable_mosaic.version = 11 : i64} {
  func.func @_channel_attn_kernel(%arg0: i32, %arg1: i32, %arg2: memref<1x32x64xf32, #tpu.memory_space<vmem>>, %arg3: memref<32x2xf32, #tpu.memory_space<vmem>>, %arg4: memref<2x32xf32, #tpu.memory_space<vmem>>, %arg5: memref<1x1x32xf32, #tpu.memory_space<vmem>>, %arg6: memref<1x32xf32, #tpu.memory_space<vmem>>, %arg7: memref<1x32xf32, #tpu.memory_space<vmem>>) attributes {dimension_semantics = [#tpu.dimension_semantics<parallel>, #tpu.dimension_semantics<arbitrary>], iteration_bounds = array<i64: 2, 1>, scalar_prefetch = 0 : i64, scratch_operands = 2 : i64, tpu.core_type = #tpu.core_type<tc>, window_params = [{transform_indices = @transform_0, window_bounds = array<i64: 1, 32, 64>}, {pipeline_mode = #tpu.pipeline_mode<synchronous>, transform_indices = @transform_1, window_bounds = array<i64: 32, 2>}, {pipeline_mode = #tpu.pipeline_mode<synchronous>, transform_indices = @transform_2, window_bounds = array<i64: 2, 32>}, {transform_indices = @transform_3, window_bounds = array<i64: 1, 1, 32>}]} {
    %c0_i32 = arith.constant 0 : i32
    %0 = arith.cmpi eq, %arg1, %c0_i32 : i32
    %1 = arith.extui %0 : i1 to i32
    %c0_i32_0 = arith.constant 0 : i32
    %2 = arith.cmpi ne, %1, %c0_i32_0 : i32
    scf.if %2 {
      %cst_14 = arith.constant 0.000000e+00 : f32
      %15 = vector.broadcast %cst_14 : f32 to vector<1x32xf32>
      %c0_15 = arith.constant 0 : index
      %c0_16 = arith.constant 0 : index
      %16 = vector.load %arg6[%c0_15, %c0_16] : memref<1x32xf32, #tpu.memory_space<vmem>>, vector<1x32xf32>
      tpu.vector_store %arg6[%c0_15, %c0_16], %15 {strides = array<i32>} : memref<1x32xf32, #tpu.memory_space<vmem>>, vector<1x32xf32>,
      %cst_17 = arith.constant 0xFF800000 : f32
      %17 = vector.broadcast %cst_17 : f32 to vector<1x32xf32>
      %c0_18 = arith.constant 0 : index
      %c0_19 = arith.constant 0 : index
      %18 = vector.load %arg7[%c0_18, %c0_19] : memref<1x32xf32, #tpu.memory_space<vmem>>, vector<1x32xf32>
      tpu.vector_store %arg7[%c0_18, %c0_19], %17 {strides = array<i32>} : memref<1x32xf32, #tpu.memory_space<vmem>>, vector<1x32xf32>,
    } else {
    }
    %c0 = arith.constant 0 : index
    %c0_1 = arith.constant 0 : index
    %c0_2 = arith.constant 0 : index
    %3 = vector.load %arg2[%c0, %c0_1, %c0_2] : memref<1x32x64xf32, #tpu.memory_space<vmem>>, vector<1x32x64xf32>
    %c0_3 = arith.constant 0 : index
    %c0_4 = arith.constant 0 : index
    %4 = vector.load %arg6[%c0_3, %c0_4] : memref<1x32xf32, #tpu.memory_space<vmem>>, vector<1x32xf32>
    %cst = arith.constant dense<0.000000e+00> : vector<1x32xf32>
    %5 = vector.multi_reduction <add>, %3, %cst [2] : vector<1x32x64xf32> to vector<1x32xf32>
    %6 = arith.addf %4, %5 : vector<1x32xf32>
    %c0_5 = arith.constant 0 : index
    %c0_6 = arith.constant 0 : index
    %7 = vector.load %arg6[%c0_5, %c0_6] : memref<1x32xf32, #tpu.memory_space<vmem>>, vector<1x32xf32>
    tpu.vector_store %arg6[%c0_5, %c0_6], %6 {strides = array<i32>} : memref<1x32xf32, #tpu.memory_space<vmem>>, vector<1x32xf32>,
    %cst_7 = arith.constant dense<0xFF800000> : vector<1x32xf32>
    %8 = vector.multi_reduction <maximumf>, %3, %cst_7 [2] : vector<1x32x64xf32> to vector<1x32xf32>
    %c0_8 = arith.constant 0 : index
    %c0_9 = arith.constant 0 : index
    %9 = vector.load %arg7[%c0_8, %c0_9] : memref<1x32xf32, #tpu.memory_space<vmem>>, vector<1x32xf32>
    %10 = arith.maximumf %9, %8 : vector<1x32xf32>
    %c0_10 = arith.constant 0 : index
    %c0_11 = arith.constant 0 : index
    %11 = vector.load %arg7[%c0_10, %c0_11] : memref<1x32xf32, #tpu.memory_space<vmem>>, vector<1x32xf32>
    tpu.vector_store %arg7[%c0_10, %c0_11], %10 {strides = array<i32>} : memref<1x32xf32, #tpu.memory_space<vmem>>, vector<1x32xf32>,
    %c0_i32_12 = arith.constant 0 : i32
    %12 = arith.cmpi eq, %arg1, %c0_i32_12 : i32
    %13 = arith.extui %12 : i1 to i32
    %c0_i32_13 = arith.constant 0 : i32
    %14 = arith.cmpi ne, %13, %c0_i32_13 : i32
    scf.if %14 {
      %c0_14 = arith.constant 0 : index
      %c0_15 = arith.constant 0 : index
      %15 = vector.load %arg6[%c0_14, %c0_15] : memref<1x32xf32, #tpu.memory_space<vmem>>, vector<1x32xf32>
      %cst_16 = arith.constant 1.562500e-02 : f32
      %16 = vector.broadcast %cst_16 : f32 to vector<1x32xf32>
      %17 = arith.mulf %15, %16 : vector<1x32xf32>
      %c0_17 = arith.constant 0 : index
      %c0_18 = arith.constant 0 : index
      %18 = vector.load %arg7[%c0_17, %c0_18] : memref<1x32xf32, #tpu.memory_space<vmem>>, vector<1x32xf32>
      %19 = tpu.concatenate %17, %18 in 0 : vector<1x32xf32>, vector<1x32xf32> -> vector<2x32xf32>
      %c0_19 = arith.constant 0 : index
      %c0_20 = arith.constant 0 : index
      %20 = vector.load %arg3[%c0_19, %c0_20] : memref<32x2xf32, #tpu.memory_space<vmem>>, vector<32x2xf32>
      %cst_21 = arith.constant dense<0.000000e+00> : vector<2x2xf32>
      %21 = tpu.matmul %19, %20, %cst_21 {dimension_numbers = #tpu.dot_dimension_numbers<[1], [0], [0], [1], [0, 0, 1, 1], [], []>} : vector<2x32xf32>, vector<32x2xf32>, vector<2x2xf32> -> vector<2x2xf32>
      %cst_22 = arith.constant 0.000000e+00 : f32
      %22 = vector.broadcast %cst_22 : f32 to vector<2x2xf32>
      %23 = arith.maximumf %21, %22 : vector<2x2xf32>
      %c0_23 = arith.constant 0 : index
      %c0_24 = arith.constant 0 : index
      %24 = vector.load %arg4[%c0_23, %c0_24] : memref<2x32xf32, #tpu.memory_space<vmem>>, vector<2x32xf32>
      %cst_25 = arith.constant dense<0.000000e+00> : vector<2x32xf32>
      %25 = tpu.matmul %23, %24, %cst_25 {dimension_numbers = #tpu.dot_dimension_numbers<[1], [0], [0], [1], [0, 0, 1, 1], [], []>} : vector<2x2xf32>, vector<2x32xf32>, vector<2x32xf32> -> vector<2x32xf32>
      %26 = vector.extract_strided_slice %25 {offsets = [0, 0], sizes = [1, 32], strides = [1, 1]} : vector<2x32xf32> to vector<1x32xf32>
      %27 = vector.extract_strided_slice %25 {offsets = [1, 0], sizes = [1, 32], strides = [1, 1]} : vector<2x32xf32> to vector<1x32xf32>
      %28 = arith.addf %26, %27 : vector<1x32xf32>
      %29 = arith.negf %28 : vector<1x32xf32>
      %30 = math.exp %29 : vector<1x32xf32>
      %cst_26 = arith.constant 1.000000e+00 : f32
      %31 = vector.broadcast %cst_26 : f32 to vector<1x32xf32>
      %32 = arith.addf %31, %30 : vector<1x32xf32>
      %33 = arith.divf %31, %32 : vector<1x32xf32>
      %34 = vector.shape_cast %33 : vector<1x32xf32> to vector<1x1x32xf32>
      %c0_27 = arith.constant 0 : index
      %c0_28 = arith.constant 0 : index
      %c0_29 = arith.constant 0 : index
      %35 = vector.load %arg5[%c0_27, %c0_28, %c0_29] : memref<1x1x32xf32, #tpu.memory_space<vmem>>, vector<1x1x32xf32>
      tpu.vector_store %arg5[%c0_27, %c0_28, %c0_29], %34 {strides = array<i32>} : memref<1x1x32xf32, #tpu.memory_space<vmem>>, vector<1x1x32xf32>,
    } else {
    }
    return
  }
  func.func @transform_0(%arg0: i32, %arg1: i32) -> (i32, i32, i32) {
    %c0_i32 = arith.constant 0 : i32
    %c0_i32_0 = arith.constant 0 : i32
    return %arg0, %c0_i32, %arg1 : i32, i32, i32
  }
  func.func @transform_1(%arg0: i32, %arg1: i32) -> (i32, i32) {
    %c0_i32 = arith.constant 0 : i32
    %c0_i32_0 = arith.constant 0 : i32
    %c0_i32_1 = arith.constant 0 : i32
    return %c0_i32, %c0_i32_0 : i32, i32
  }
  func.func @transform_2(%arg0: i32, %arg1: i32) -> (i32, i32) {
    %c0_i32 = arith.constant 0 : i32
    %c0_i32_0 = arith.constant 0 : i32
    %c0_i32_1 = arith.constant 0 : i32
    return %c0_i32, %c0_i32_0 : i32, i32
  }
  func.func @transform_3(%arg0: i32, %arg1: i32) -> (i32, i32, i32) {
    %c0_i32 = arith.constant 0 : i32
    %c0_i32_0 = arith.constant 0 : i32
    %c0_i32_1 = arith.constant 0 : i32
    return %arg0, %c0_i32, %c0_i32_0 : i32, i32, i32
  }
}

</mosaic_0001>

<bundles_post_ra>
// kernel: tpu_custom_call.1
= control target key start
LH: loop header
LB: loop body
LE: loop exit
PB: predicated region body
PF: predicated region fallthrough
CT: control target
= control target key end

     0   :  { %8 = vsyncpa [#allocation5], 0  ;;  %s1900_s0 = inlined_call_operand.hbm [shape: f32[2,32,64], index: 0, kind: input, shape index: {}]   ;;  %s1901_s1 = inlined_call_operand.vmem [shape: f32[32,2], index: 1, kind: input, shape index: {}]   ;;  %s1902_s2 = inlined_call_operand.vmem [shape: f32[2,32], index: 2, kind: input, shape index: {}]   ;;  %s1903_s3 = inlined_call_operand.hbm [shape: f32[2,1,32], index: 3, kind: output, shape index: {}]  }
   0x1   :  { %10 = vsyncpa [#allocation5 + $0x1], 0 }
   0x2   :  { %11 = vsyncpa [#allocation6], 0 }
   0x3   :  { %13 = vsyncpa [#allocation6 + $0x1], 0  ;;  %s1541_s12 = smov 0   ;;  %s1543_s13 = smov 0  }
   0x4   :  { %s1545_s14 = smov 0   ;;  %s1547_s15 = smov 0  }
   0x5   :  { %s1549_s16 = smov 0   ;;  %s1551_s17 = smov 0  }
   0x6 LB: > { %s1274_s18 = sadd.s32 4294967295, %s1509_s17   ;;  %s1275_s19 = sadd.s32 4294967294, %s1509_s17   ;;  %s1509_s17 = sphi %s1551_s17, %s19_s17   ;;  %s1505_s16 = sphi %s1549_s16, %s1918_s16   ;;  %s1501_s15 = sphi %s1547_s15, %s1917_s15   ;;  %s1497_s14 = sphi %s1545_s14, %s1916_s14   ;;  %s1493_s13 = sphi %s1543_s13, %s1915_s13   ;;  %s1489_s12 = sphi %s1541_s12, %s1914_s12  }
   0x7   : > { %s31_s20 = sadd.s32 1, %s1505_s16  ;;  %s40_s21 = sadd.s32 1, %s1497_s14 }
   0x8   : > { %p33_p0 = scmp.ge.s32.totalorder %s31_s20, 2  ;;  %p47_p1 = scmp.ne.s32.totalorder %s1497_s14, %s1493_s13 }
   0x9   : > { %p48_p2 = scmp.eq.s32.totalorder %s1509_s17, 0  ;;  %p53_p3 = scmp.ne.s32.totalorder %s1493_s13, %s1489_s12 }
   0xa   : > { %s1920_s20 = smov (%p33_p0, %s31_s20), 0  ;;  %p54_p5 = scmp.eq.s32.totalorder %s1274_s18, 0 }
   0xb   : > { %p1582_p4 = por %p48_p2, %p47_p1  ;;  %s35_s23 = ssub.s32 %s1505_s16, %s1920_s20 }
   0xc   : > { %p119_p6 = scmp.eq.s32.totalorder %s1274_s18, 1  ;;  %p38_p7 = scmp.eq.s32.totalorder %s35_s23, 0 }
   0xd   : > { %p1588_p8 = por %p54_p5, %p53_p3  ;;  %p125_p10 = scmp.eq.s32.totalorder %s1275_s19, 1 }
   0xe   : > { %p1592_p9 = por %p119_p6, %p47_p1  ;;  %p1333_p13 = scmp.lt.s32.totalorder %s1509_s17, 2 }
   0xf   : > { %s1597_s26 = scalar_select %p38_p7, %s1497_s14, %s40_s21  }
  0x10   : > { %s1907_s25 = scalar_select %p1592_p9, 1, 0 }
  0x11   : > { %p1599_p11 = por %p125_p10, %p53_p3  ;;  %s151_s28 = sand.u32 1, %s1497_s14  }
  0x12   : > { %s1278_s29 = sshll.u32 %s151_s28, 5  ;;  %s1291_s30 = sshll.u32 %s1505_s16, 9 }
  0x13   : > { %s1908_s27 = scalar_select %p1599_p11, 1, 0 }
  0x14   : > { %s1610_s6 = scalar_lea.hbm %s1900_s0, %s1291_s30  ;;  %s155_s7 = scalar_lea.vmem [#allocation4], %s1278_s29 }
  0x15   : > { %s163_s8 = sshll.u32 %s155_s7, 4  ;;  %p1616_p0 = pnand %p1333_p13, %p1582_p4  ;;  %s1612_s8 = int_to_ptr.vmem [resolvable:$true] %s163_s8 }
  0x16   : > { %s1621_s10 = scalar_lea.sflag [#allocation5], %s151_s28  ;;  %s1397_s11 = scalar_lea.hbm %s1610_s6, 512 }
  0x17   : > { %p1398_p2 = scmp.ne.s32.totalorder %s1610_s6, %s1397_s11  ;;  %p1399_p3 = pneg %p1616_p0 }
  0x18   : > { %s1402_s21 = scalar_lea.hbm %s1900_s0, 1024  ;;  %p1403_p4 = scmp.lt.u32.totalorder %s1610_s6, %s1900_s0 }
  0x19   : > { %p1400_p5 = pnand %p1399_p3, %p1398_p2  ;;  %p1404_p7 = scmp.lt.u32.totalorder %s1402_s21, %s1397_s11 }
  0x1a   : > { %p1406_p13 = scmp.lt.u32.totalorder %s1397_s11, %s1610_s6 }
  0x1b   : > { %p1401_p6 = pneg %p1400_p5  ;;  %p1405_p10 = por %p1404_p7, %p1403_p4 }
  0x1d   : > { %p1407_p12 = por %p1406_p13, %p1405_p10 }
  0x1f   : > { %p1408_p1 = pnand %p1407_p12, %p1401_p6 }
  0x21   : > { %1411 = shalt.err (!%p1408_p1)
}
  0x22   : > { %s1412_s28 = scalar_lea.vmem %s1612_s8, 512  ;;  %s1511_s29 = smov [#allocation4]  }
  0x23   : > { %p1413_p2 = scmp.ne.s32.totalorder %s1612_s8, %s1412_s28  ;;  %s1417_s30 = sshll.u32 %s1511_s29, 4  ;;  %s1418_s30 = int_to_ptr.vmem [resolvable:$false] %s1417_s30 }
  0x24   : > { %s1419_s4 = scalar_lea.vmem %s1418_s30, 1024  ;;  %p1420_p9 = scmp.lt.s32.totalorder %s1612_s8, %s1418_s30 }
  0x25   : > { %p1415_p5 = pnand %p1413_p2, %p1399_p3  ;;  %p1421_p4 = scmp.lt.s32.totalorder %s1419_s4, %s1412_s28 }
  0x27   : > { %p1416_p11 = pneg %p1415_p5  ;;  %p1422_p7 = por %p1421_p4, %p1420_p9 }
  0x29   : > { %p1423_p10 = pnand %p1422_p7, %p1416_p11 }
  0x2b   : > { %1426 = shalt.err (!%p1423_p10)
}
  0x2c   : > { %s1512_s5 = smov 128   ;;  %s1513_s7 = smov 8  }
  0x2d   : > { %1328 = dma.hbm_to_vmem [thread:$0]  (!%p1616_p0), %s1610_s6, 512, %s1612_s8, %s1621_s10, %s1512_s5, %s1512_s5, %s1513_s7  }
  0x2e   : > { %p171_p12 = scmp.lt.s32.totalorder %s1509_s17, 3  ;;  %p1910_p1 = scmp.ge.s32.totalorder %s1509_s17, 1 }
  0x30   : > { %p172_p3 = pnand %p1910_p1, %p171_p12 }
  0x31   : > { %s1653_s11 = sand.u32 (!%p172_p3), 1, %s1493_s13  }
  0x32   : > { %175 = sbr.rel (%p172_p3) target bundleno = 867 (0x363), region = 32  ;;  %s1282_s18 = sshll.u32 (!%p172_p3), %s1653_s11, 5 }
  0x33   : > { %s178_s19 = scalar_lea.sflag (!%p172_p3), [#allocation5], %s1653_s11  ;;  %s181_s21 = scalar_lea.vmem (!%p172_p3), [#allocation4], %s1282_s18 }
  0x39   : > { %1480 = dma.done.wait (%p1588_p8), %s178_s19, 512  }
  0x3a   : > { %1482 = vsyncadd (%p1588_p8), %s178_s19, 4294966784  ;;  %vm215_vm0 = vcmask 523264   ;;  %v210_v0 = vld [vmem:[%s181_s21] sm:$0xff]  ;;  %v211_v1 = vld [vmem:[%s181_s21 + $0x8] sm:$0xff]  ;;  %v1514_v12 = vmov 0   ;;  %v232_v13 = vlaneseq  ;;  %vm207_vm1 = vcmask 253952  }
  0x3b   : > { %v212_v2 = vld [vmem:[%s181_s21 + $0x10] sm:$0xff]  ;;  %v216_v3 = vsel %vm215_vm0, %v210_v0, 0.0  ;;  %v213_v5 = vld [vmem:[%s181_s21 + $0x18] sm:$0xff]  ;;  %v219_v6 = vsel %vm215_vm0, %v211_v1, 0.0  ;;  %v613_v8 = vsel %vm215_vm0, %v210_v0, -inf  ;;  %v616_v9 = vsel %vm215_vm0, %v211_v1, -inf  ;;  %1391 = vset.pattern.permute.xlu0 %v1514_v12  ;;  %1392 = vset.pattern.permute.xlu1 %v1514_v12 }
  0x3c   : > { %v222_v4 = vsel %vm215_vm0, %v212_v2, 0.0  ;;  %217 = vadd.xlane.f32.xlu0 %v216_v3  ;;  %v225_v7 = vsel %vm215_vm0, %v213_v5, 0.0  ;;  %v619_v10 = vsel %vm215_vm0, %v212_v2, -inf  ;;  %v622_v11 = vsel %vm215_vm0, %v213_v5, -inf  ;;  %s1288_s4 = sshll.u32 %s1501_s15, 4  ;;  %s202_s5 = scalar_lea.vmem [#allocation7], %s1653_s11 }
  0x3d   : > { %223 = vadd.xlane.f32.xlu1 %v222_v4  ;;  %v1515_v14 = vmov 1966171168   ;;  %v1670_v16 = vshrl.u32 %v232_v13, 7  ;;  %vm1519_vm2 = vmmov 0   ;;  %vm579_vm3 = vcmask 130112   ;;  %s1198_s7 = sshll.u32 %s202_s5, 4  ;;  %s1850_s21 = scalar_lea.hbm %s1903_s3, %s1288_s4  ;;  %s1852_s7 = int_to_ptr.vmem [resolvable:$true] %s1198_s7 }
  0x3e   : > { %v365_v15 = vunpack.c.l.s4 %v1515_v14  ;;  %vm586_vm4 = vcmask 195712   ;;  %vm593_vm5 = vcmask 261312   ;;  %vm1014_vm6 = vcmask 1040384   ;;  %s1186_s24 = scalar_lea.sflag [#allocation6], %s1653_s11  ;;  %s1427_s6 = scalar_lea.vmem %s1852_s7, 16 }
  0x3f   : > { %v1673_v18 = vsub.s32 0, %v1670_v16  ;;  %v1676_v19 = vsub.s32 1, %v1670_v16  ;;  %v1679_v20 = vsub.s32 2, %v1670_v16  ;;  %v1682_v21 = vsub.s32 3, %v1670_v16  ;;  %p1428_p8 = scmp.ne.s32.totalorder %s1852_s7, %s1427_s6  ;;  %p1911_p9 = scmp.ne.s32.totalorder %s1907_s25, 0 }
  0x40   : > { %220 = vadd.xlane.f32.xlu0 %v219_v6  ;;  %v366_v17 = vunpack.c.0.s8 %v365_v15  ;;  %v1685_v22 = vsub.s32 4, %v1670_v16  ;;  %v1688_v23 = vsub.s32 5, %v1670_v16  ;;  %v1691_v24 = vsub.s32 6, %v1670_v16  ;;  %s1520_s15 = smov [#allocation7]  }
  0x41   : > { %226 = vadd.xlane.f32.xlu1 %v225_v7  ;;  %v1694_v25 = vsub.s32 7, %v1670_v16  ;;  %vm1020_vm7 = vcmask 261120   ;;  %vm1100_vm8 = vcmask 1041408   ;;  %vm1096_vm9 = vcmask 15360   ;;  %p1429_p11 = pnand %p1428_p8, %p1911_p9  ;;  %s1431_s8 = sshll.u32 %s1520_s15, 4  ;;  %s1432_s8 = int_to_ptr.vmem [resolvable:$false] %s1431_s8 }
  0x42   : > { %v1697_v28 = vsub.s32 %v366_v17, %v1670_v16  ;;  %s1433_s9 = scalar_lea.vmem %s1432_s8, 32  ;;  %p1434_p6 = scmp.lt.s32.totalorder %s1852_s7, %s1432_s8 }
  0x43   : > { %p1430_p0 = pneg %p1429_p11  ;;  %p1435_p13 = scmp.lt.s32.totalorder %s1433_s9, %s1427_s6 }
  0x44   : > { %614 = vmax.xlane.f32.xlu0 %v613_v8 }
  0x45   : > { %617 = vmax.xlane.f32.xlu1 %v616_v9  ;;  %p1436_p2 = por %p1435_p13, %p1434_p6 }
  0x47   : > { %p1437_p5 = pnand %p1436_p2, %p1430_p0 }
  0x48   : > { %620 = vmax.xlane.f32.xlu0 %v619_v10 }
  0x49   : > { %623 = vmax.xlane.f32.xlu1 %v622_v11 }
  0xc9   : > { %v218_v26 = vpop.xlane.xlu0 %217 }
  0xca   : > { %v224_v27 = vpop.xlane.xlu1 %223  ;;  %v235_v29 = vrot.slane %v218_v26, %v1673_v18  ;;  %v239_v30 = vrot.slane %v218_v26, %v1676_v19  ;;  %v243_v31 = vrot.slane %v218_v26, %v1679_v20  ;;  %v247_v32 = vrot.slane %v218_v26, %v1682_v21 }
  0xcb   : > { %v251_v33 = vrot.slane %v218_v26, %v1685_v22  ;;  %v255_v34 = vrot.slane %v218_v26, %v1688_v23  ;;  %v259_v35 = vrot.slane %v218_v26, %v1691_v24  ;;  %v263_v36 = vrot.slane %v218_v26, %v1694_v25 }
  0xcc   : > { %v360_v37 = vcombine.low %v235_v29, %v239_v30  ;;  %v361_v38 = vcombine.low %v243_v31, %v247_v32  ;;  %v299_v39 = vrot.slane %v224_v27, %v1673_v18  ;;  %v303_v40 = vrot.slane %v224_v27, %v1676_v19 }
  0xcd   : > { %v221_v41 = vpop.xlane.xlu0 %220  ;;  %v362_v42 = vcombine.low %v251_v33, %v255_v34  ;;  %v363_v43 = vcombine.low %v259_v35, %v263_v36  ;;  %v307_v44 = vrot.slane %v224_v27, %v1679_v20  ;;  %v311_v45 = vrot.slane %v224_v27, %v1682_v21 }
  0xce   : > { %v370_v46 = vrot.slane %v360_v37, %v1697_v28  ;;  %v377_v47 = vrot.slane %v361_v38, %v1697_v28  ;;  %v267_v48 = vrot.slane %v221_v41, %v1673_v18  ;;  %v271_v49 = vrot.slane %v221_v41, %v1676_v19  ;;  %v227_v2 = vpop.xlane.xlu1 %226 }
  0xcf   : > { %v384_v50 = vrot.slane %v362_v42, %v1697_v28  ;;  %v391_v51 = vrot.slane %v363_v43, %v1697_v28  ;;  %v275_v52 = vrot.slane %v221_v41, %v1679_v20  ;;  %v279_v53 = vrot.slane %v221_v41, %v1682_v21 }
  0xd0   : > { %v392_v54 = vcombine.low %v370_v46, %v377_v47  ;;  %v283_v55 = vrot.slane %v221_v41, %v1685_v22  ;;  %v287_v56 = vrot.slane %v221_v41, %v1688_v23  ;;  %v291_v57 = vrot.slane %v221_v41, %v1691_v24 }
  0xd1   : > { %v393_v58 = vcombine.low %v384_v50, %v391_v51  ;;  %v295_v59 = vrot.slane %v221_v41, %v1694_v25  ;;  %v409_v60 = vcombine.low %v267_v48, %v271_v49  ;;  %v410_v61 = vcombine.low %v275_v52, %v279_v53  ;;  %v615_v38 = vpop.xlane.xlu0 %614 }
  0xd2   : > { %v400_v62 = vrot.slane %v392_v54, %v1697_v28  ;;  %v411_v63 = vcombine.low %v283_v55, %v287_v56  ;;  %v315_v0 = vrot.slane %v224_v27, %v1685_v22  ;;  %v319_v1 = vrot.slane %v224_v27, %v1688_v23  ;;  %v618_v55 = vpop.xlane.xlu1 %617 }
  0xd3   : > { %v407_v3 = vrot.slane %v393_v58, %v1697_v28  ;;  %v412_v4 = vcombine.low %v291_v57, %v295_v59  ;;  %v419_v5 = vrot.slane %v409_v60, %v1697_v28  ;;  %v426_v6 = vrot.slane %v410_v61, %v1697_v28 }
  0xd4   : > { %v433_v7 = vrot.slane %v411_v63, %v1697_v28  ;;  %v323_v8 = vrot.slane %v224_v27, %v1691_v24  ;;  %v327_v9 = vrot.slane %v224_v27, %v1694_v25  ;;  %v458_v10 = vcombine.low %v299_v39, %v303_v40 }
  0xd5   : > { %v408_v11 = vcombine.low %v400_v62, %v407_v3  ;;  %v440_v12 = vrot.slane %v412_v4, %v1697_v28  ;;  %v441_v14 = vcombine.low %v419_v5, %v426_v6  ;;  %v459_v15 = vcombine.low %v307_v44, %v311_v45 }
  0xd6   : > { %v460_v17 = vcombine.low %v315_v0, %v319_v1  ;;  %v461_v26 = vcombine.low %v323_v8, %v327_v9  ;;  %v468_v29 = vrot.slane %v458_v10, %v1697_v28  ;;  %v331_v30 = vrot.slane %v227_v2, %v1673_v18 }
  0xd7   : > { %557 = vperm.xlu0 %1391, %v408_v11   ;;  %v442_v31 = vcombine.low %v433_v7, %v440_v12  ;;  %v449_v32 = vrot.slane %v441_v14, %v1697_v28  ;;  %v475_v33 = vrot.slane %v459_v15, %v1697_v28  ;;  %v335_v27 = vrot.slane %v227_v2, %v1676_v19 }
  0xd8   : > { %v482_v34 = vrot.slane %v460_v17, %v1697_v28  ;;  %v489_v35 = vrot.slane %v461_v26, %v1697_v28  ;;  %v339_v36 = vrot.slane %v227_v2, %v1679_v20  ;;  %v343_v37 = vrot.slane %v227_v2, %v1682_v21  ;;  %v621_v26 = vpop.xlane.xlu0 %620 }
  0xd9   : > { %v456_v39 = vrot.slane %v442_v31, %v1697_v28  ;;  %v490_v40 = vcombine.low %v468_v29, %v475_v33  ;;  %v347_v41 = vrot.slane %v227_v2, %v1685_v22  ;;  %v351_v42 = vrot.slane %v227_v2, %v1688_v23 }
  0xda   : > { %v491_v43 = vcombine.low %v482_v34, %v489_v35  ;;  %v355_v44 = vrot.slane %v227_v2, %v1691_v24  ;;  %v359_v45 = vrot.slane %v227_v2, %v1694_v25  ;;  %v507_v46 = vcombine.low %v331_v30, %v335_v27 }
  0xdb   : > { %v457_v47 = vcombine.low %v449_v32, %v456_v39  ;;  %v498_v48 = vrot.slane %v490_v40, %v1697_v28  ;;  %v508_v49 = vcombine.low %v339_v36, %v343_v37  ;;  %v509_v50 = vcombine.low %v347_v41, %v351_v42 }
  0xdc   : > { %v505_v51 = vrot.slane %v491_v43, %v1697_v28  ;;  %v510_v52 = vcombine.low %v355_v44, %v359_v45  ;;  %v517_v53 = vrot.slane %v507_v46, %v1697_v28  ;;  %v633_v54 = vrot.slane %v615_v38, %v1673_v18 }
  0xdd   : > { %560 = vperm.xlu1 %1392, %v457_v47   ;;  %v524_v56 = vrot.slane %v508_v49, %v1697_v28  ;;  %v531_v57 = vrot.slane %v509_v50, %v1697_v28  ;;  %v637_v58 = vrot.slane %v615_v38, %v1676_v19  ;;  %v641_v59 = vrot.slane %v615_v38, %v1679_v20 }
  0xde   : > { %v506_v60 = vcombine.low %v498_v48, %v505_v51  ;;  %v538_v61 = vrot.slane %v510_v52, %v1697_v28  ;;  %v645_v62 = vrot.slane %v615_v38, %v1682_v21  ;;  %v649_v63 = vrot.slane %v615_v38, %v1685_v22  ;;  %v624_v48 = vpop.xlane.xlu1 %623 }
  0xdf   : > { %v539_v0 = vcombine.low %v517_v53, %v524_v56  ;;  %v653_v1 = vrot.slane %v615_v38, %v1688_v23  ;;  %v657_v2 = vrot.slane %v615_v38, %v1691_v24  ;;  %v661_v3 = vrot.slane %v615_v38, %v1694_v25 }
  0xe0   : > { %v540_v4 = vcombine.low %v531_v57, %v538_v61  ;;  %v758_v5 = vcombine.low %v633_v54, %v637_v58  ;;  %v759_v6 = vcombine.low %v641_v59, %v645_v62  ;;  %v665_v7 = vrot.slane %v618_v55, %v1673_v18 }
  0xe1   : > { %563 = vperm.xlu1 %1392, %v506_v60   ;;  %v547_v8 = vrot.slane %v539_v0, %v1697_v28  ;;  %v760_v9 = vcombine.low %v649_v63, %v653_v1  ;;  %v761_v10 = vcombine.low %v657_v2, %v661_v3  ;;  %v669_v11 = vrot.slane %v618_v55, %v1676_v19 }
  0xe2   : > { %v554_v12 = vrot.slane %v540_v4, %v1697_v28  ;;  %v768_v14 = vrot.slane %v758_v5, %v1697_v28  ;;  %v775_v15 = vrot.slane %v759_v6, %v1697_v28  ;;  %v673_v17 = vrot.slane %v618_v55, %v1679_v20 }
  0xe3   : > { %v782_v29 = vrot.slane %v760_v9, %v1697_v28  ;;  %v789_v30 = vrot.slane %v761_v10, %v1697_v28  ;;  %v677_v31 = vrot.slane %v618_v55, %v1682_v21  ;;  %v681_v32 = vrot.slane %v618_v55, %v1685_v22 }
  0xe4   : > { %v555_v33 = vcombine.low %v547_v8, %v554_v12  ;;  %v790_v27 = vcombine.low %v768_v14, %v775_v15  ;;  %v685_v34 = vrot.slane %v618_v55, %v1688_v23  ;;  %v689_v35 = vrot.slane %v618_v55, %v1691_v24 }
  0xe5   : > { %v791_v36 = vcombine.low %v782_v29, %v789_v30  ;;  %v693_v37 = vrot.slane %v618_v55, %v1694_v25  ;;  %v807_v38 = vcombine.low %v665_v7, %v669_v11  ;;  %v808_v39 = vcombine.low %v673_v17, %v677_v31 }
  0xe6   : > { %566 = vperm.xlu1 %1392, %v555_v33   ;;  %v798_v40 = vrot.slane %v790_v27, %v1697_v28  ;;  %v809_v41 = vcombine.low %v681_v32, %v685_v34  ;;  %v697_v42 = vrot.slane %v621_v26, %v1673_v18  ;;  %v701_v43 = vrot.slane %v621_v26, %v1676_v19 }
  0xe7   : > { %v805_v44 = vrot.slane %v791_v36, %v1697_v28  ;;  %v810_v45 = vcombine.low %v689_v35, %v693_v37  ;;  %v817_v46 = vrot.slane %v807_v38, %v1697_v28  ;;  %v824_v47 = vrot.slane %v808_v39, %v1697_v28  ;;  %v1016_v38 = vld [vmem:[%s1901_s1] sm:$0xff]  ;;  %v1017_v39 = vld [vmem:[%s1901_s1 + $0x8] sm:$0xff] }
  0xe8   : > { %v831_v49 = vrot.slane %v809_v41, %v1697_v28  ;;  %v705_v50 = vrot.slane %v621_v26, %v1679_v20  ;;  %v709_v51 = vrot.slane %v621_v26, %v1682_v21  ;;  %v713_v52 = vrot.slane %v621_v26, %v1685_v22  ;;  %v1018_v41 = vld [vmem:[%s1901_s1 + $0x10] sm:$0xff] }
  0xe9   : > { %v806_v53 = vcombine.low %v798_v40, %v805_v44  ;;  %v838_v54 = vrot.slane %v810_v45, %v1697_v28  ;;  %v839_v55 = vcombine.low %v817_v46, %v824_v47  ;;  %v717_v56 = vrot.slane %v621_v26, %v1688_v23 }
  0xea   : > { %v721_v57 = vrot.slane %v621_v26, %v1691_v24  ;;  %v725_v58 = vrot.slane %v621_v26, %v1694_v25  ;;  %v856_v59 = vcombine.low %v697_v42, %v701_v43  ;;  %v857_v60 = vcombine.low %v705_v50, %v709_v51  ;;  %v1019_v42 = vld [vmem:[%s1901_s1 + $0x18] sm:$0xff] }
  0xeb   : > { %955 = vperm.xlu1 %1392, %v806_v53   ;;  %v840_v61 = vcombine.low %v831_v49, %v838_v54  ;;  %v847_v62 = vrot.slane %v839_v55, %v1697_v28  ;;  %v858_v63 = vcombine.low %v713_v52, %v717_v56  ;;  %v729_v0 = vrot.slane %v624_v48, %v1673_v18 }
  0xec   : > { %v859_v1 = vcombine.low %v721_v57, %v725_v58  ;;  %v866_v2 = vrot.slane %v856_v59, %v1697_v28  ;;  %v873_v3 = vrot.slane %v857_v60, %v1697_v28  ;;  %v733_v4 = vrot.slane %v624_v48, %v1676_v19 }
  0xed   : > { %v854_v5 = vrot.slane %v840_v61, %v1697_v28  ;;  %v880_v6 = vrot.slane %v858_v63, %v1697_v28  ;;  %v737_v7 = vrot.slane %v624_v48, %v1679_v20  ;;  %v741_v8 = vrot.slane %v624_v48, %v1682_v21 }
  0xee   : > { %v887_v9 = vrot.slane %v859_v1, %v1697_v28  ;;  %v888_v10 = vcombine.low %v866_v2, %v873_v3  ;;  %v745_v18 = vrot.slane %v624_v48, %v1685_v22  ;;  %v749_v11 = vrot.slane %v624_v48, %v1688_v23 }
  0xef   : > { %v855_v12 = vcombine.low %v847_v62, %v854_v5  ;;  %v753_v14 = vrot.slane %v624_v48, %v1691_v24  ;;  %v757_v19 = vrot.slane %v624_v48, %v1694_v25  ;;  %v905_v15 = vcombine.low %v729_v0, %v733_v4 }
  0xf0   : > { %v889_v17 = vcombine.low %v880_v6, %v887_v9  ;;  %v896_v26 = vrot.slane %v888_v10, %v1697_v28  ;;  %v906_v29 = vcombine.low %v737_v7, %v741_v8  ;;  %v907_v20 = vcombine.low %v745_v18, %v749_v11 }
  0xf1   : > { %958 = vperm.xlu1 %1392, %v855_v12   ;;  %v908_v21 = vcombine.low %v753_v14, %v757_v19  ;;  %v915_v30 = vrot.slane %v905_v15, %v1697_v28  ;;  %v1516_v34 = vmov 0.0   ;;  %v1517_v37 = vmov -inf  }
  0xf2   : > { %v903_v31 = vrot.slane %v889_v17, %v1697_v28  ;;  %v922_v22 = vrot.slane %v906_v29, %v1697_v28  ;;  %v929_v23 = vrot.slane %v907_v20, %v1697_v28  ;;  %208 = vst.msk [vmem:[#allocation2] sm:$0x1] %vm207_vm1, %v1516_v34  ;;  %1310 = vmatprep.subr.mxu1 %v1516_v34  ;;  %209 = vst.msk [vmem:[#allocation3] sm:$0x1] %vm207_vm1, %v1517_v37  ;;  %v1518_v43 = vmov 0.0|0.0  }
  0xf3   : > { %v936_v24 = vrot.slane %v908_v21, %v1697_v28  ;;  %v1316_v40 = vpack.c.bf16 %v1017_v39, %v1016_v38  ;;  %1315 = vmatprep.subr.bf16.mxu0 %v1518_v43  ;;  %1307 = vmatprep.mubr.msk.f32.mxu0 %vm1519_vm2, %v1516_v34  ;;  %v1319_v44 = vpack.c.bf16 %v1019_v42, %v1018_v41  ;;  %v569_v45 = vand.u32 127, %v232_v13  ;;  %v1095_v21 = vld [vmem:[%s1902_s2] sm:$0x3] }
  0xf4   : > { %v904_v32 = vcombine.low %v896_v26, %v903_v31  ;;  %v937_v25 = vcombine.low %v915_v30, %v922_v22  ;;  %1312 = vmatprep.mubr.msk.f32.mxu1 %vm1519_vm2, %v1516_v34  ;;  %1311 = vmatpush3.msk.msra.mxu1 %vm1100_vm8, %v1095_v21 }
  0xf5   : > { %v938_v33 = vcombine.low %v929_v23, %v936_v24  ;;  %1317 = vmatpush3.bf16.msra.mxu0 %v1316_v40  ;;  %v574_v46 = vadd.s32 4294967288, %v569_v45  ;;  %v581_v47 = vadd.s32 4294967280, %v569_v45  ;;  %v588_v50 = vadd.s32 4294967272, %v569_v45 }
  0xf6   : > { %961 = vperm.xlu1 %1392, %v904_v32   ;;  %v945_v27 = vrot.slane %v937_v25, %v1697_v28  ;;  %1318 = vmatprep.subr.bf16.mxu0 %v1518_v43  ;;  %v572_v52 = vsub.s32 %v569_v45, %v1670_v16 }
  0xf7   : > { %v952_v35 = vrot.slane %v938_v33, %v1697_v28  ;;  %v577_v49 = vsub.s32 %v574_v46, %v1670_v16  ;;  %v584_v51 = vsub.s32 %v581_v47, %v1670_v16  ;;  %v591_v56 = vsub.s32 %v588_v50, %v1670_v16 }
  0xf9   : > { %v953_v36 = vcombine.low %v945_v27, %v952_v35  ;;  %1320 = vmatpush3.bf16.msra.mxu0 %v1319_v44  ;;  %v214_v1 = vld [vmem:[#allocation2] sm:$0x1]  ;;  %v625_v14 = vld [vmem:[#allocation3] sm:$0x1] }
  0xfb   : > { %964 = vperm.xlu1 %1392, %v953_v36  }
 0x156   : > { %v558_v54 = vpop.permute.xlu0 %557 }
 0x157   : > { %v573_v58 = vrot.slane %v558_v54, %v572_v52 }
 0x15c   : > { %v561_v48 = vpop.permute.xlu1 %560 }
 0x15d   : > { %v578_v55 = vrot.slane %v561_v48, %v577_v49 }
 0x15f   : > { %v580_v59 = vsel %vm579_vm3, %v578_v55, %v573_v58 }
 0x160   : > { %v564_v53 = vpop.permute.xlu1 %563 }
 0x161   : > { %v585_v57 = vrot.slane %v564_v53, %v584_v51 }
 0x163   : > { %v587_v61 = vsel %vm586_vm4, %v585_v57, %v580_v59 }
 0x165   : > { %v567_v13 = vpop.permute.xlu1 %566 }
 0x166   : > { %v592_v60 = vrot.slane %v567_v13, %v591_v56 }
 0x168   : > { %v594_v62 = vsel %vm593_vm5, %v592_v60, %v587_v61 }
 0x169   : > { %v601_v63 = vrot.slane %v594_v62, %v1697_v28 }
 0x16a   : > { %v956_v0 = vpop.permute.xlu1 %955 }
 0x16b   : > { %v608_v2 = vrot.slane %v601_v63, %v1697_v28  ;;  %v969_v7 = vrot.slane %v956_v0, %v572_v52 }
 0x16d   : > { %v610_v16 = vadd.f32 %v608_v2, %v214_v1 }
 0x16f   : > { %612 = vst.msk [vmem:[#allocation2] sm:$0x1] %vm207_vm1, %v610_v16 }
 0x170   : > { %v959_v3 = vpop.permute.xlu1 %958 }
 0x171   : > { %v973_v5 = vrot.slane %v959_v3, %v577_v49 }
 0x173   : > { %v974_v9 = vsel %vm579_vm3, %v973_v5, %v969_v7 }
 0x175   : > { %v962_v4 = vpop.permute.xlu1 %961 }
 0x176   : > { %v978_v6 = vrot.slane %v962_v4, %v584_v51  ;;  %v1005_v17 = vld [vmem:[#allocation2] sm:$0x1] }
 0x177   : > { %v1006_v26 = vmul.f32 0.015625, %v1005_v17 }
 0x178   : > { %v979_v18 = vsel %vm586_vm4, %v978_v6, %v974_v9 }
 0x17a   : > { %v965_v8 = vpop.permute.xlu1 %964 }
 0x17b   : > { %v983_v10 = vrot.slane %v965_v8, %v591_v56 }
 0x17d   : > { %v984_v11 = vsel %vm593_vm5, %v983_v10, %v979_v18 }
 0x17e   : > { %v991_v12 = vrot.slane %v984_v11, %v1697_v28 }
 0x180   : > { %v998_v19 = vrot.slane %v991_v12, %v1697_v28 }
 0x182   : > { %v1000_v15 = vmax.f32 %v625_v14, %v998_v19 }
 0x184   : > { %1001 = vst.msk [vmem:[#allocation3] sm:$0x1] %vm207_vm1, %v1000_v15 }
 0x18b   : > { %v1283_v29 = vld [vmem:[#allocation3] ss:$0 sm:$0xff] }
 0x18c   : > { %v1015_v20 = vsel %vm1014_vm6, %v1006_v26, %v1283_v29 }
 0x18d   : > { %1308 = vmatmul.mubr.msk.f32.vlgmr.msra.gmra.mrb[0].mxu0 %vm1020_vm7, %v1015_v20 }
 0x260   : > { %v1090_v30 = vpop.f32.mrb[0].mxu0 }
 0x261   : > { %v1094_v28 = vmax.f32 %v1090_v30, 0.0  ;;  %v1309_v31 = vpop.f32.mrb[1].mxu0 }
 0x263   : > { %1313 = vmatmul.mubr.msk.f32.vlgmr.msra.gmra.mrb[0].mxu1 %vm1096_vm9, %v1094_v28 }
 0x336   : > { %v1170_v22 = vpop.f32.mrb[0].mxu1 }
 0x337   : > { %v1175_v23 = vrot.slane %v1170_v22, 1  ;;  %v1314_v24 = vpop.f32.mrb[1].mxu1 }
 0x339   : > { %v1177_v32 = vadd.f32 %v1175_v23, %v1170_v22 }
 0x33b   : > { %v1287_v25 = vmul.f32 -1.442695, %v1177_v32 }
 0x33d   : > { %1393 = vpow2.f32 %v1287_v25 }
 0x347   : > { %v1394_v33 = vpop.eup %1393 }
 0x348   : > { %v1181_v27 = vadd.f32 1.0, %v1394_v33 }
 0x34a   : > { %1395 = vrcp.f32 %v1181_v27 }
 0x354   : > { %v1396_v34 = vpop.eup %1395 }
 0x355   : > { %1184 = vst.msk [vmem:[%s202_s5] sm:$0x1] %vm207_vm1, %v1396_v34 }
 0x356   : > { %1440 = shalt.err (!%p1437_p5)
}
 0x357   : > { %s1441_s11 = scalar_lea.hbm %s1850_s21, 16  ;;  %s1445_s23 = scalar_lea.hbm %s1903_s3, 32 }
 0x358   : > { %p1442_p4 = scmp.ne.s32.totalorder %s1850_s21, %s1441_s11  ;;  %p1446_p12 = scmp.lt.u32.totalorder %s1850_s21, %s1903_s3 }
 0x359   : > { %p1447_p1 = scmp.lt.u32.totalorder %s1445_s23, %s1441_s11  ;;  %p1449_p8 = scmp.lt.u32.totalorder %s1441_s11, %s1850_s21 }
 0x35a   : > { %p1443_p7 = pnand %p1442_p4, %p1911_p9 }
 0x35b   : > { %p1448_p3 = por %p1447_p1, %p1446_p12 }
 0x35c   : > { %p1444_p10 = pneg %p1443_p7 }
 0x35d   : > { %p1450_p11 = por %p1449_p8, %p1448_p3 }
 0x35f   : > { %p1451_p0 = pnand %p1450_p11, %p1444_p10 }
 0x361   : > { %1454 = shalt.err (!%p1451_p0)
}
 0x362   : > { %1323 = dma.vmem_to_hbm [thread:$0]  (%p1911_p9), %s1852_s7, 16, %s1850_s21, %s1186_s24  }
 0x363 PF: > { %s1210_s30 = sand.u32 1, %s1489_s12   ;;  %p1912_p6 = scmp.ne.s32.totalorder %s1908_s27, 0 }
 0x364   : > { %p1913_p13 = scmp.ge.s32.totalorder %s1509_s17, 2  ;;  %s1211_s4 = scalar_lea.sflag [#allocation6], %s1210_s30 }
 0x366   : > { %p1330_p2 = pnand %p1913_p13, %p1912_p6 }
 0x368   : > { %1484 = dma.done.wait (!%p1330_p2), %s1211_s4, 16  }
 0x369   : > { %1486 = vsyncadd (!%p1330_p2), %s1211_s4, 4294967280  ;;  %s19_s17 = sadd.s32 1, %s1509_s17   ;;  %s1914_s12 = smov %s1493_s13 }
 0x36a   : > { %p16_p5 = scmp.ge.s32.totalorder %s19_s17, 4   ;;  %s1915_s13 = smov %s1497_s14 }
 0x36b   : > { %s1916_s14 = smov %s1597_s26  ;;  %s1917_s15 = smov %s1505_s16 }
 0x36c   : > { %s1918_s16 = smov %s1920_s20  ;;  %18 = sbr.rel (!%p16_p5) target bundleno = 6 (0x6), region = 85 }
 0x373   :  { %1215 = vsyncpa [#allocation5], 1 }
 0x374   :  { %1217 = vsyncpa [#allocation5 + $0x1], 1 }
 0x375   :  { %1218 = vsyncpa [#allocation6], 1 }
 0x376   :  { %1220 = vsyncpa [#allocation6 + $0x1], 1 }

</bundles_post_ra>
